<compile_context>
chip_gen: v7x
topology: tpu7x:2x2x1
jax: 0.10.0
libtpu: 0.0.40
codegen_flags: <defaults>
</compile_context>

<pallas_src>
import functools

import jax
import jax.numpy as jnp
from jax.experimental import pallas as pl
from jax.experimental.pallas import tpu as pltpu

LN_EPS = 1e-5

_W_TILE_BUDGET = 12 * 1024 * 1024   # bytes of bf16 W^T we allow resident / per K tile
_VMEM_BUDGET = 40 * 1024 * 1024     # total working-set target (fits v7x 64 MiB/TC w/ headroom)


def _round_up(a, b):
    return ((a + b - 1) // b) * b


# ---------------------------------------------------------------------------
# Kernels
# ---------------------------------------------------------------------------

def _ln_epilogue(y, bias, gamma, beta, o_ref, *, proj, p_pad, eps):
    """LayerNorm over the *real* projection dim of y (padded cols of y are exactly 0)."""
    y = y + bias
    inv_p = 1.0 / proj
    mean = jnp.sum(y, axis=-1, keepdims=True) * inv_p          # padded cols sum to 0
    centered = y - mean
    ssq = jnp.sum(centered * centered, axis=-1, keepdims=True)
    if p_pad != proj:
        # Padded columns of y are exactly 0 (zero W^T cols + zero bias), so each
        # contributes exactly mean^2 to sum((y-mean)^2): subtract analytically
        # instead of masking (keeps two-pass variance accuracy, zero extra passes).
        ssq = ssq - (p_pad - proj) * (mean * mean)
    inv = jax.lax.rsqrt(ssq * inv_p + eps)                      # EUP slot (cheap)
    # padded gamma/beta are 0 -> padded output cols are 0 (sliced off anyway)
    o_ref[...] = (centered * inv * gamma + beta).astype(o_ref.dtype)


def _adapter_kernel(x_ref, w_ref, b_ref, g_ref, beta_ref, o_ref, *, proj, p_pad, eps):
    # Fast path: whole contraction dim in one MXU pass (W^T VMEM-resident, single-buffered).
    y = jnp.dot(x_ref[...].astype(jnp.bfloat16), w_ref[...],
                preferred_element_type=jnp.float32)
    _ln_epilogue(y, b_ref[...], g_ref[...], beta_ref[...], o_ref,
                 proj=proj, p_pad=p_pad, eps=eps)


def _adapter_kernel_ktiled(x_ref, w_ref, b_ref, g_ref, beta_ref, o_ref, acc_ref,
                           *, proj, p_pad, eps):
    # Large-hidden path: W^T streamed as (tk, p_pad) tiles, f32 accumulator scratch.
    k = pl.program_id(1)

    @pl.when(k == 0)
    def _():
        acc_ref[...] = jnp.zeros_like(acc_ref)

    acc_ref[...] += jnp.dot(x_ref[...].astype(jnp.bfloat16), w_ref[...],
                            preferred_element_type=jnp.float32)

    @pl.when(k == pl.num_programs(1) - 1)
    def _():
        _ln_epilogue(acc_ref[...], b_ref[...], g_ref[...], beta_ref[...], o_ref,
                     proj=proj, p_pad=p_pad, eps=eps)


# ---------------------------------------------------------------------------
# Host-side helpers
# ---------------------------------------------------------------------------

def prepare_adapter_params(w, b, gamma, beta):
    """One-time (per-adapter) weight prep: transpose, pad to a lane/MXU-friendly
    width, cast to bf16. Hoisted out of the per-call path."""
    proj, hidden = w.shape
    align = 256 if proj > 128 else 128    # 256-wide N for v6e/v7x MXU; 128 keeps v5e happy
    p_pad = _round_up(proj, align)
    pad = p_pad - proj
    wt = jnp.pad(w.T.astype(jnp.bfloat16), ((0, 0), (0, pad)))         # (hidden, p_pad)
    b2 = jnp.pad(b.astype(jnp.float32), (0, pad)).reshape(1, p_pad)
    g2 = jnp.pad(gamma.astype(jnp.float32), (0, pad)).reshape(1, p_pad)
    bt2 = jnp.pad(beta.astype(jnp.float32), (0, pad)).reshape(1, p_pad)
    return {"wt": wt, "b": b2, "gamma": g2, "beta": bt2,
            "proj": proj, "hidden": hidden, "p_pad": p_pad}


def _choose_tk(hidden, p_pad):
    """Contraction tile: full hidden when W^T fits comfortably, else the largest
    multiple of 128 dividing hidden whose double-buffered tile fits the budget."""
    if hidden * p_pad * 2 <= _W_TILE_BUDGET or hidden % 128 != 0:
        return hidden
    tk = (hidden // 128) * 128
    while tk > 128 and (hidden % tk != 0 or 2 * tk * p_pad * 2 > _W_TILE_BUDGET):
        tk -= 128
    return tk if hidden % tk == 0 else hidden


def _choose_tm(M, hidden, p_pad, tk, k_steps, x_itemsize, out_itemsize):
    tm = min(512, _round_up(max(M, 16), 16))
    if M >= 32:
        # keep >= 2 row steps so both v7x TensorCores get work under "parallel"
        tm = min(tm, _round_up(pl.cdiv(M, 2), 16))

    def vmem_bytes(t):
        u = 2 * t * tk * x_itemsize                 # x tile (double-buffered)
        u += 2 * t * p_pad * out_itemsize           # out tile (double-buffered)
        u += 3 * p_pad * 4                          # bias / gamma / beta (single-buffered)
        if k_steps > 1:
            u += 2 * tk * p_pad * 2                 # W^T tile (double-buffered, streamed)
            u += t * p_pad * 4                      # f32 accumulator scratch
        else:
            u += hidden * p_pad * 2                 # full W^T (single-buffered, resident)
        return u

    while tm > 16 and vmem_bytes(tm) > _VMEM_BUDGET:
        tm = max(16, _round_up(tm // 2, 16))
    return tm, vmem_bytes(tm)


def linear_adapter_with_layernorm(x, params, *, eps=LN_EPS, tk=None):
    """x: (batch, seq, hidden); params from prepare_adapter_params()."""
    batch, seq, hidden = x.shape
    assert hidden == params["hidden"], "hidden dim mismatch vs prepared weights"
    proj, p_pad = params["proj"], params["p_pad"]
    out_dtype = x.dtype
    x_itemsize = jnp.dtype(x.dtype).itemsize
    out_itemsize = jnp.dtype(out_dtype).itemsize

    M = batch * seq
    x2 = x.reshape(M, hidden)                       # contiguous -> free; no pad, no cast

    if tk is None:
        tk = _choose_tk(hidden, p_pad)
    assert hidden % tk == 0 and (tk == hidden or tk % 128 == 0)
    k_steps = hidden // tk
    tm, vmem_used = _choose_tm(M, hidden, p_pad, tk, k_steps, x_itemsize, out_itemsize)
    m_steps = pl.cdiv(M, tm)                        # ragged M handled by Pallas block masking

    cost = pl.CostEstimate(
        flops=2 * M * hidden * p_pad + 8 * M * p_pad,
        transcendentals=M,                          # one rsqrt per row
        bytes_accessed=(M * hidden * x_itemsize + hidden * p_pad * 2
                        + 3 * p_pad * 4 + M * p_pad * out_itemsize),
    )
    compiler_params = pltpu.CompilerParams(
        dimension_semantics=("parallel",) if k_steps == 1 else ("parallel", "arbitrary"),
        # size-derived limit with headroom; never the full physical VMEM of v7x
        vmem_limit_bytes=min(max(2 * vmem_used, 32 * 1024 * 1024), 56 * 1024 * 1024),
    )
    invariant = dict(pipeline_mode=pl.Buffered(1))  # grid-invariant operands: single buffer

    if k_steps == 1:
        kernel = functools.partial(_adapter_kernel, proj=proj, p_pad=p_pad, eps=eps)
        grid_spec = pltpu.PrefetchScalarGridSpec(
            num_scalar_prefetch=0,
            grid=(m_steps,),
            in_specs=[
                pl.BlockSpec((tm, hidden), lambda i: (i, 0)),
                pl.BlockSpec((hidden, p_pad), lambda i: (0, 0), **invariant),
                pl.BlockSpec((1, p_pad), lambda i: (0, 0), **invariant),
                pl.BlockSpec((1, p_pad), lambda i: (0, 0), **invariant),
                pl.BlockSpec((1, p_pad), lambda i: (0, 0), **invariant),
            ],
            out_specs=pl.BlockSpec((tm, p_pad), lambda i: (i, 0)),
        )
    else:
        kernel = functools.partial(_adapter_kernel_ktiled, proj=proj, p_pad=p_pad, eps=eps)
        grid_spec = pltpu.PrefetchScalarGridSpec(
            num_scalar_prefetch=0,
            grid=(m_steps, k_steps),
            in_specs=[
                pl.BlockSpec((tm, tk), lambda i, k: (i, k)),
                pl.BlockSpec((tk, p_pad), lambda i, k: (k, 0)),
                pl.BlockSpec((1, p_pad), lambda i, k: (0, 0), **invariant),
                pl.BlockSpec((1, p_pad), lambda i, k: (0, 0), **invariant),
                pl.BlockSpec((1, p_pad), lambda i, k: (0, 0), **invariant),
            ],
            out_specs=pl.BlockSpec((tm, p_pad), lambda i, k: (i, 0)),
            scratch_shapes=[pltpu.VMEM((tm, p_pad), jnp.float32)],
        )

    out = pl.pallas_call(
        kernel,
        out_shape=jax.ShapeDtypeStruct((M, p_pad), out_dtype),
        grid_spec=grid_spec,
        compiler_params=compiler_params,
        cost_estimate=cost,
    )(x2, params["wt"], params["b"], params["gamma"], params["beta"])

    if p_pad != proj:                               # skip slice when already lane-aligned
        out = out[:, :proj]
    return out.reshape(batch, seq, proj)


# ---------------------------------------------------------------------------
# Reference + tests
# ---------------------------------------------------------------------------

def _reference(x, w, b, gamma, beta, *, cast_bf16=False):
    if cast_bf16:
        y = jnp.dot(x.astype(jnp.bfloat16), w.T.astype(jnp.bfloat16),
                    preferred_element_type=jnp.float32) + b
    else:
        y = x @ w.T + b
    mean = y.mean(axis=-1, keepdims=True)
    var = ((y - mean) ** 2).mean(axis=-1, keepdims=True)
    return (y - mean) / jnp.sqrt(var + LN_EPS) * gamma + beta


if __name__ == "__main__":
    key = jax.random.PRNGKey(0)

    # --- Small config matching the module: batch=2, seq=8, hidden=32, proj=64 ---
    batch, seq, hidden_dim, projection_dim = 2, 8, 32, 64
    kx, kw, kb = jax.random.split(key, 3)
    x = jax.random.normal(kx, (batch, seq, hidden_dim), dtype=jnp.float32)
    bound = 1.0 / (hidden_dim ** 0.5)
    w = jax.random.uniform(kw, (projection_dim, hidden_dim),
                           minval=-bound, maxval=bound, dtype=jnp.float32)
    b = jax.random.uniform(kb, (projection_dim,),
                           minval=-bound, maxval=bound, dtype=jnp.float32)
    gamma = jnp.ones((projection_dim,), dtype=jnp.float32)    # LayerNorm weight
    beta = jnp.zeros((projection_dim,), dtype=jnp.float32)    # LayerNorm bias

    params = prepare_adapter_params(w, b, gamma, beta)        # hoisted, once per adapter
    out = linear_adapter_with_layernorm(x, params)
    jax.block_until_ready(out)
    assert out.shape == (batch, seq, projection_dim)
    ref = _reference(x, w, b, gamma, beta)
    # bf16 matmul inputs => loosened tolerance vs the pure-f32 module semantics.
    assert jnp.allclose(out, ref, atol=5e-2, rtol=0.0), "mismatch vs f32 reference"

    # --- Ragged config: M % tm != 0 and proj % 128 != 0 (masked rows + padded LN) ---
    b2_, s2_, h2_, p2_ = 3, 37, 160, 200
    k1, k2, k3 = jax.random.split(jax.random.PRNGKey(1), 3)
    x_r = jax.random.normal(k1, (b2_, s2_, h2_), dtype=jnp.float32)
    bound2 = 1.0 / (h2_ ** 0.5)
    w_r = jax.random.uniform(k2, (p2_, h2_), minval=-bound2, maxval=bound2, dtype=jnp.float32)
    b_r = jax.random.uniform(k3, (p2_,), minval=-bound2, maxval=bound2, dtype=jnp.float32)
    g_r = jnp.ones((p2_,), dtype=jnp.float32)
    be_r = jnp.zeros((p2_,), dtype=jnp.float32)

    params_r = prepare_adapter_params(w_r, b_r, g_r, be_r)
    out_r = linear_adapter_with_layernorm(x_r, params_r)
    jax.block_until_ready(out_r)
    assert out_r.shape == (b2_, s2_, p2_)
    ref_r = _reference(x_r, w_r, b_r, g_r, be_r, cast_bf16=True)
    assert jnp.allclose(out_r, ref_r, atol=1e-2, rtol=0.0), "mismatch vs bf16 reference (ragged)"

    # --- Force the K-tiled accumulator path on a small shape (hidden=256, tk=128) ---
    b3_, s3_, h3_, p3_ = 2, 24, 256, 128
    k4, k5, k6 = jax.random.split(jax.random.PRNGKey(2), 3)
    x_k = jax.random.normal(k4, (b3_, s3_, h3_), dtype=jnp.float32)
    bound3 = 1.0 / (h3_ ** 0.5)
    w_k = jax.random.uniform(k5, (p3_, h3_), minval=-bound3, maxval=bound3, dtype=jnp.float32)
    b_k = jax.random.uniform(k6, (p3_,), minval=-bound3, maxval=bound3, dtype=jnp.float32)
    g_k = jnp.ones((p3_,), dtype=jnp.float32)
    be_k = jnp.zeros((p3_,), dtype=jnp.float32)

    params_k = prepare_adapter_params(w_k, b_k, g_k, be_k)
    out_k = linear_adapter_with_layernorm(x_k, params_k, tk=128)
    jax.block_until_ready(out_k)
    assert out_k.shape == (b3_, s3_, p3_)
    ref_k = _reference(x_k, w_k, b_k, g_k, be_k, cast_bf16=True)
    assert jnp.allclose(out_k, ref_k, atol=1e-2, rtol=0.0), "mismatch vs bf16 reference (K-tiled)"

    print("KERNEL_OK")
</pallas_src>

<mosaic_0001>
module attributes {stable_mosaic.version = 11 : i64} {
  func.func @_adapter_kernel(%arg0: i32, %arg1: memref<16x32xf32, #tpu.memory_space<vmem>>, %arg2: memref<32x128xbf16, #tpu.memory_space<vmem>>, %arg3: memref<1x128xf32, #tpu.memory_space<vmem>>, %arg4: memref<1x128xf32, #tpu.memory_space<vmem>>, %arg5: memref<1x128xf32, #tpu.memory_space<vmem>>, %arg6: memref<16x128xf32, #tpu.memory_space<vmem>>) attributes {dimension_semantics = [#tpu.dimension_semantics<parallel>], iteration_bounds = array<i64: 1>, scalar_prefetch = 0 : i64, scratch_operands = 0 : i64, tpu.core_type = #tpu.core_type<tc>, window_params = [{transform_indices = @transform_0, window_bounds = array<i64: 16, 32>}, {pipeline_mode = #tpu.pipeline_mode<synchronous>, transform_indices = @transform_1, window_bounds = array<i64: 32, 128>}, {pipeline_mode = #tpu.pipeline_mode<synchronous>, transform_indices = @transform_2, window_bounds = array<i64: 1, 128>}, {pipeline_mode = #tpu.pipeline_mode<synchronous>, transform_indices = @transform_3, window_bounds = array<i64: 1, 128>}, {pipeline_mode = #tpu.pipeline_mode<synchronous>, transform_indices = @transform_4, window_bounds = array<i64: 1, 128>}, {transform_indices = @transform_5, window_bounds = array<i64: 16, 128>}]} {
    %c0 = arith.constant 0 : index
    %c0_0 = arith.constant 0 : index
    %0 = vector.load %arg1[%c0, %c0_0] : memref<16x32xf32, #tpu.memory_space<vmem>>, vector<16x32xf32>
    %1 = arith.truncf %0 : vector<16x32xf32> to vector<16x32xbf16>
    %c0_1 = arith.constant 0 : index
    %c0_2 = arith.constant 0 : index
    %2 = vector.load %arg2[%c0_1, %c0_2] : memref<32x128xbf16, #tpu.memory_space<vmem>>, vector<32x128xbf16>
    %cst = arith.constant dense<0.000000e+00> : vector<16x128xf32>
    %3 = tpu.matmul %1, %2, %cst {dimension_numbers = #tpu.dot_dimension_numbers<[1], [0], [0], [1], [0, 0, 1, 1], [], []>} : vector<16x32xbf16>, vector<32x128xbf16>, vector<16x128xf32> -> vector<16x128xf32>
    %c0_3 = arith.constant 0 : index
    %c0_4 = arith.constant 0 : index
    %4 = vector.load %arg3[%c0_3, %c0_4] : memref<1x128xf32, #tpu.memory_space<vmem>>, vector<1x128xf32>
    %c0_5 = arith.constant 0 : index
    %c0_6 = arith.constant 0 : index
    %5 = vector.load %arg4[%c0_5, %c0_6] : memref<1x128xf32, #tpu.memory_space<vmem>>, vector<1x128xf32>
    %c0_7 = arith.constant 0 : index
    %c0_8 = arith.constant 0 : index
    %6 = vector.load %arg5[%c0_7, %c0_8] : memref<1x128xf32, #tpu.memory_space<vmem>>, vector<1x128xf32>
    %7 = vector.broadcast %4 : vector<1x128xf32> to vector<16x128xf32>
    %8 = arith.addf %3, %7 : vector<16x128xf32>
    %cst_9 = arith.constant dense<0.000000e+00> : vector<16xf32>
    %9 = vector.multi_reduction <add>, %8, %cst_9 [1] : vector<16x128xf32> to vector<16xf32>
    %10 = vector.shape_cast %9 : vector<16xf32> to vector<16x1xf32>
    %cst_10 = arith.constant 1.562500e-02 : f32
    %11 = vector.broadcast %cst_10 : f32 to vector<16x1xf32>
    %12 = arith.mulf %10, %11 : vector<16x1xf32>
    %13 = vector.broadcast %12 : vector<16x1xf32> to vector<16x128xf32>
    %14 = arith.subf %8, %13 : vector<16x128xf32>
    %15 = arith.mulf %14, %14 : vector<16x128xf32>
    %cst_11 = arith.constant dense<0.000000e+00> : vector<16xf32>
    %16 = vector.multi_reduction <add>, %15, %cst_11 [1] : vector<16x128xf32> to vector<16xf32>
    %17 = vector.shape_cast %16 : vector<16xf32> to vector<16x1xf32>
    %18 = arith.mulf %12, %12 : vector<16x1xf32>
    %cst_12 = arith.constant 6.400000e+01 : f32
    %19 = vector.broadcast %cst_12 : f32 to vector<16x1xf32>
    %20 = arith.mulf %19, %18 : vector<16x1xf32>
    %21 = arith.subf %17, %20 : vector<16x1xf32>
    %cst_13 = arith.constant 1.562500e-02 : f32
    %22 = vector.broadcast %cst_13 : f32 to vector<16x1xf32>
    %23 = arith.mulf %21, %22 : vector<16x1xf32>
    %cst_14 = arith.constant 9.99999974E-6 : f32
    %24 = vector.broadcast %cst_14 : f32 to vector<16x1xf32>
    %25 = arith.addf %23, %24 : vector<16x1xf32>
    %26 = math.rsqrt %25 : vector<16x1xf32>
    %27 = vector.broadcast %26 : vector<16x1xf32> to vector<16x128xf32>
    %28 = arith.mulf %14, %27 : vector<16x128xf32>
    %29 = vector.broadcast %5 : vector<1x128xf32> to vector<16x128xf32>
    %30 = arith.mulf %28, %29 : vector<16x128xf32>
    %31 = vector.broadcast %6 : vector<1x128xf32> to vector<16x128xf32>
    %32 = arith.addf %30, %31 : vector<16x128xf32>
    %c0_15 = arith.constant 0 : index
    %c0_16 = arith.constant 0 : index
    %33 = vector.load %arg6[%c0_15, %c0_16] : memref<16x128xf32, #tpu.memory_space<vmem>>, vector<16x128xf32>
    tpu.vector_store %arg6[%c0_15, %c0_16], %32 {strides = array<i32>} : memref<16x128xf32, #tpu.memory_space<vmem>>, vector<16x128xf32>,
    return
  }
  func.func @transform_0(%arg0: i32) -> (i32, i32) {
    %c0_i32 = arith.constant 0 : i32
    %c0_i32_0 = arith.constant 0 : i32
    return %arg0, %c0_i32 : i32, i32
  }
  func.func @transform_1(%arg0: i32) -> (i32, i32) {
    %c0_i32 = arith.constant 0 : i32
    %c0_i32_0 = arith.constant 0 : i32
    %c0_i32_1 = arith.constant 0 : i32
    return %c0_i32, %c0_i32_0 : i32, i32
  }
  func.func @transform_2(%arg0: i32) -> (i32, i32) {
    %c0_i32 = arith.constant 0 : i32
    %c0_i32_0 = arith.constant 0 : i32
    %c0_i32_1 = arith.constant 0 : i32
    return %c0_i32, %c0_i32_0 : i32, i32
  }
  func.func @transform_3(%arg0: i32) -> (i32, i32) {
    %c0_i32 = arith.constant 0 : i32
    %c0_i32_0 = arith.constant 0 : i32
    %c0_i32_1 = arith.constant 0 : i32
    return %c0_i32, %c0_i32_0 : i32, i32
  }
  func.func @transform_4(%arg0: i32) -> (i32, i32) {
    %c0_i32 = arith.constant 0 : i32
    %c0_i32_0 = arith.constant 0 : i32
    %c0_i32_1 = arith.constant 0 : i32
    return %c0_i32, %c0_i32_0 : i32, i32
  }
  func.func @transform_5(%arg0: i32) -> (i32, i32) {
    %c0_i32 = arith.constant 0 : i32
    %c0_i32_0 = arith.constant 0 : i32
    return %arg0, %c0_i32 : i32, i32
  }
}

</mosaic_0001>

<bundles_post_ra>
// kernel: tpu_custom_call.1
= control target key start
LH: loop header
LB: loop body
LE: loop exit
PB: predicated region body
PF: predicated region fallthrough
CT: control target
= control target key end

     0   :  { %10 = vsyncpa [#allocation3], 0  ;;  %s381_s0 = inlined_call_operand.hbm [shape: f32[16,32], index: 0, kind: input, shape index: {}]   ;;  %s382_s1 = inlined_call_operand.hbm [shape: bf16[32,128], index: 1, kind: input, shape index: {}]   ;;  %s383_s2 = inlined_call_operand.vmem [shape: f32[1,128], index: 2, kind: input, shape index: {}]   ;;  %s384_s3 = inlined_call_operand.vmem [shape: f32[1,128], index: 3, kind: input, shape index: {}]   ;;  %s385_s4 = inlined_call_operand.vmem [shape: f32[1,128], index: 4, kind: input, shape index: {}]   ;;  %s386_s5 = inlined_call_operand.hbm [shape: f32[16,128], index: 5, kind: output, shape index: {}]  }
   0x1   :  { %11 = vsyncpa [#allocation6], 0 }
   0x2   :  { %12 = vsyncpa [#allocation4], 0  ;;  %s291_s18 = smov [#allocation2]   ;;  %s219_s22 = scalar_lea.hbm %s381_s0, 256 }
   0x3   :  { %s18_s19 = sshll.u32 %s291_s18, 4  ;;  %p220_p0 = scmp.ne.s32.totalorder %s381_s0, %s219_s22  ;;  %s19_s19 = int_to_ptr.vmem [resolvable:$true] %s18_s19 }
   0x4   :  { %p223_p1 = scmp.lt.u32.totalorder %s219_s22, %s381_s0 }
   0x6   :  { %p225_p2 = pnand %p223_p1, %p220_p0 }
   0x8   :  { %228 = shalt.err (!%p225_p2)
}
   0x9   :  { %s229_s27 = scalar_lea.vmem %s19_s19, 256  ;;  %p234_p4 = scmp.lt.s32.totalorder %s19_s19, %s19_s19 }
   0xa   :  { %p230_p3 = scmp.ne.s32.totalorder %s19_s19, %s229_s27  ;;  %p235_p5 = scmp.lt.s32.totalorder %s229_s27, %s229_s27 }
   0xc   :  { %p236_p6 = por %p235_p5, %p234_p4 }
   0xe   :  { %p237_p7 = pnand %p236_p6, %p230_p3 }
  0x10   :  { %240 = shalt.err (!%p237_p7)
}
  0x11   :  { %s292_s28 = smov 128   ;;  %s293_s29 = smov 8  }
  0x12   :  { %24 = dma.hbm_to_vmem [thread:$0]  %s381_s0, 256, %s19_s19, [#allocation3], %s292_s28, %s292_s28, %s293_s29  }
  0x13   :  { %s294_s7 = smov [#allocation5]   ;;  %s241_s11 = scalar_lea.hbm %s382_s1, 256 }
  0x14   :  { %s30_s8 = sshll.u32 %s294_s7, 4  ;;  %p242_p8 = scmp.ne.s32.totalorder %s382_s1, %s241_s11  ;;  %s31_s8 = int_to_ptr.vmem [resolvable:$true] %s30_s8 }
  0x15   :  { %p245_p9 = scmp.lt.u32.totalorder %s241_s11, %s382_s1 }
  0x17   :  { %p247_p10 = pnand %p245_p9, %p242_p8 }
  0x19   :  { %250 = shalt.err (!%p247_p10)
}
  0x1a   :  { %s251_s16 = scalar_lea.vmem %s31_s8, 256  ;;  %p256_p12 = scmp.lt.s32.totalorder %s31_s8, %s31_s8 }
  0x1b   :  { %p252_p11 = scmp.ne.s32.totalorder %s31_s8, %s251_s16  ;;  %p257_p13 = scmp.lt.s32.totalorder %s251_s16, %s251_s16 }
  0x1d   :  { %p258_p0 = por %p257_p13, %p256_p12 }
  0x1f   :  { %p259_p1 = pnand %p258_p0, %p252_p11 }
  0x21   :  { %262 = shalt.err (!%p259_p1)
}
  0x22   :  { %s295_s0 = smov 64   ;;  %s296_s17 = smov 4  }
  0x23   :  { %36 = dma.hbm_to_vmem [thread:$0]  %s382_s1, 256, %s31_s8, [#allocation6], %s295_s0, %s295_s0, %s296_s17  }
  0x24   :  { %285 = dma.done.wait [#allocation3], 256  }
  0x25   :  { %286 = vsyncadd [#allocation3], 4294967040 }
  0x26   :  { %287 = dma.done.wait [#allocation6], 256  }
  0x27   :  { %288 = vsyncadd [#allocation6], 4294967040  ;;  %v297_v0 = vmov 0.0   ;;  %vm298_vm0 = vmmov 0   ;;  %v213_v1 = vld [vmem:[#allocation5] sm:$0xff]   ;;  %v214_v2 = vld [vmem:[#allocation5 + $0x8] sm:$0xff]  }
  0x28   :  { %196 = vmatprep.subr.bf16.mxu0 %v297_v0  ;;  %200 = vmatprep.mubr.msk.bf16.mxu0 %vm298_vm0, %v297_v0  ;;  %v50_v3 = vld [vmem:[#allocation2] sm:$0xff]  ;;  %v51_v4 = vld [vmem:[#allocation2 + $0x8] sm:$0xff]  ;;  %vm78_vm1 = vcmask 261120   ;;  %s299_s24 = smov [#allocation7]  }
  0x29   :  { %197 = vmatpush3.bf16.msra.mxu0 %v213_v1  ;;  %v52_v5 = vpack.c.bf16 %v51_v4, %v50_v3  ;;  %v187_v6 = vld [vmem:[%s383_s2] ss:$0 sm:$0xff]  ;;  %s174_s25 = sshll.u32 %s299_s24, 4  ;;  %s175_s25 = int_to_ptr.vmem [resolvable:$true] %s174_s25 }
  0x2a   :  { %198 = vmatprep.subr.bf16.mxu0 %v297_v0  ;;  %v191_v34 = vld [vmem:[%s384_s3] ss:$0 sm:$0xff]  ;;  %s263_s26 = scalar_lea.vmem %s175_s25, 256  ;;  %p268_p3 = scmp.lt.s32.totalorder %s175_s25, %s175_s25 }
  0x2b   :  { %v192_v36 = vld [vmem:[%s385_s4] ss:$0 sm:$0xff]  ;;  %p264_p2 = scmp.ne.s32.totalorder %s175_s25, %s263_s26  ;;  %p269_p4 = scmp.lt.s32.totalorder %s263_s26, %s263_s26 }
  0x2d   :  { %199 = vmatpush3.bf16.msra.mxu0 %v214_v2  ;;  %p270_p5 = por %p269_p4, %p268_p3 }
  0x2f   :  { %p271_p6 = pnand %p270_p5, %p264_p2 }
  0x30   :  { %201 = vmatmul.mubr.msk.bf16.vlgmr.msra.gmra.mrb[0].mxu0 %vm78_vm1, %v52_v5 }
 0x103   :  { %v116_v7 = vpop.f32.mrb[0].mxu0 }
 0x104   :  { %v117_v8 = vadd.f32 %v187_v6, %v116_v7  ;;  %v202_v9 = vpop.f32.mrb[1].mxu0 }
 0x105   :  { %v119_v10 = vpop.f32.mrb[2].mxu0 }
 0x106   :  { %123 = vadd.xlane.f32.xlu0 %v117_v8  ;;  %v203_v11 = vpop.f32.mrb[3].mxu0  ;;  %v120_v12 = vadd.f32 %v187_v6, %v119_v10 }
 0x10a   :  { %125 = vadd.xlane.f32.xlu0 %v120_v12 }
 0x193   :  { %v124_v13 = vpop.xlane.xlu0 %123 }
 0x194   :  { %v127_v14 = vmul.f32 0.015625, %v124_v13 }
 0x196   :  { %v129_v15 = vsub.f32 %v117_v8, %v127_v14  ;;  %v137_v21 = vmul.f32 %v127_v14, %v127_v14 }
 0x197   :  { %v126_v16 = vpop.xlane.xlu0 %125 }
 0x198   :  { %v128_v17 = vmul.f32 0.015625, %v126_v16  ;;  %v131_v18 = vmul.f32 %v129_v15, %v129_v15  ;;  %v139_v23 = vmul.f32 64.0, %v137_v21 }
 0x19a   :  { %v130_v19 = vsub.f32 %v120_v12, %v128_v17  ;;  %133 = vadd.xlane.f32.xlu1 %v131_v18  ;;  %v138_v22 = vmul.f32 %v128_v17, %v128_v17 }
 0x19c   :  { %v132_v20 = vmul.f32 %v130_v19, %v130_v19  ;;  %v140_v26 = vmul.f32 64.0, %v138_v22 }
 0x19e   :  { %135 = vadd.xlane.f32.xlu1 %v132_v20 }
 0x227   :  { %v134_v24 = vpop.xlane.xlu1 %133 }
 0x228   :  { %v141_v25 = vsub.f32 %v134_v24, %v139_v23 }
 0x22a   :  { %v143_v27 = vmul.f32 0.015625, %v141_v25 }
 0x22b   :  { %v136_v28 = vpop.xlane.xlu1 %135 }
 0x22c   :  { %v145_v29 = vadd.f32 1e-05, %v143_v27  ;;  %v142_v30 = vsub.f32 %v136_v28, %v140_v26 }
 0x22e   :  { %215 = vrsqrt.f32 %v145_v29  ;;  %v144_v31 = vmul.f32 0.015625, %v142_v30 }
 0x230   :  { %v146_v32 = vadd.f32 1e-05, %v144_v31 }
 0x232   :  { %217 = vrsqrt.f32 %v146_v32 }
 0x238   :  { %v216_v33 = vpop.eup %215 }
 0x239   :  { %v149_v35 = vmul.f32 %v216_v33, %v129_v15 }
 0x23b   :  { %v157_v37 = vmul.f32 %v191_v34, %v149_v35 }
 0x23c   :  { %v218_v38 = vpop.eup %217 }
 0x23d   :  { %v150_v39 = vmul.f32 %v218_v38, %v130_v19  ;;  %v165_v40 = vadd.f32 %v192_v36, %v157_v37 }
 0x23f   :  { %v158_v41 = vmul.f32 %v191_v34, %v150_v39  ;;  %167 = vst [vmem:[#allocation7] sm:$0xff] %v165_v40 }
 0x241   :  { %v166_v42 = vadd.f32 %v192_v36, %v158_v41 }
 0x243   :  { %168 = vst [vmem:[#allocation7 + $0x8] sm:$0xff] %v166_v42 }
 0x244   :  { %274 = shalt.err (!%p271_p6)
}
 0x245   :  { %s275_s27 = scalar_lea.hbm %s386_s5, 256 }
 0x246   :  { %p276_p7 = scmp.ne.s32.totalorder %s386_s5, %s275_s27  ;;  %p279_p8 = scmp.lt.u32.totalorder %s275_s27, %s386_s5 }
 0x248   :  { %p281_p9 = pnand %p279_p8, %p276_p7 }
 0x24a   :  { %284 = shalt.err (!%p281_p9)
}
 0x24b   :  { %180 = dma.vmem_to_hbm [thread:$0]  %s175_s25, 256, %s386_s5, [#allocation4], %s292_s28, %s292_s28, %s293_s29  }
 0x24c   :  { %289 = dma.done.wait [#allocation4], 256  }
 0x24d   :  { %290 = vsyncadd [#allocation4], 4294967040 }
 0x24e   :  { %184 = vsyncpa [#allocation3], 1 }
 0x24f   :  { %185 = vsyncpa [#allocation6], 1 }
 0x250   :  { %186 = vsyncpa [#allocation4], 1 }

</bundles_post_ra>
